<compile_context>
chip_gen: v5e
topology: v5e:2x2
jax: 0.10.0
libtpu: 0.0.40
codegen_flags: <defaults>
</compile_context>

<pallas_src>
import functools
import numpy as np
import jax
import jax.numpy as jnp
from jax.experimental import pallas as pl
from jax.experimental.pallas import tpu as pltpu

# ---------------- configuration (small demo shapes) ----------------
INPUT_SIZE = 64                 # stand-in for 3 * 224 * 224
HIDDEN_SIZES = [32, 16]
NUM_CLASSES = 10
DROPOUT = 0.1                   # nn.Dropout: identity in eval-mode forward
ACTIVATION = "relu"
BATCH = 8

GMM_COMPONENTS = list(range(2, 128, 4))   # 32 encoders with K = 2, 6, ..., 126
NUM_ENCODERS = len(GMM_COMPONENTS)        # 32
TOTAL_COMPONENTS = sum(GMM_COMPONENTS)    # 2048
GMM_TILE_M = 1024                         # lane tile over components -> grid=(2,)

# Precomputed segment structure for the vectorized segmented argmax.
_SEG_ONEHOT = np.zeros((TOTAL_COMPONENTS, NUM_ENCODERS), np.bool_)
_WITHIN_IDX = np.zeros((TOTAL_COMPONENTS,), np.int32)
_off = 0
for _e, _k in enumerate(GMM_COMPONENTS):
    _SEG_ONEHOT[_off:_off + _k, _e] = True
    _WITHIN_IDX[_off:_off + _k] = np.arange(_k, dtype=np.int32)
    _off += _k


# ---------------- Pallas kernels ----------------
def gmm_logprob_kernel(lhs_ref, w_ref, b_ref, o_ref):
    """log N(x; mu_k, diag var_k) + log w_k for a 1024-component tile.

    lhs = [x*x, x] (bf16, [B, 2D]); w = [-0.5/var ; mu/var] stacked ([2D, tile],
    bf16); bias holds the constant terms (f32). Single MXU pass, f32 accumulate.
    """
    o_ref[...] = (
        jnp.dot(lhs_ref[...], w_ref[...], preferred_element_type=jnp.float32)
        + b_ref[...]
    )


def gmm_logprob(lhs, w, bias):
    B, D2 = lhs.shape
    M = w.shape[1]
    tm = GMM_TILE_M
    assert M % tm == 0
    return pl.pallas_call(
        gmm_logprob_kernel,
        out_shape=jax.ShapeDtypeStruct((B, M), jnp.float32),
        grid=(M // tm,),
        in_specs=[
            pl.BlockSpec((B, D2), lambda j: (0, 0)),   # resident across tiles
            pl.BlockSpec((D2, tm), lambda j: (0, j)),
            pl.BlockSpec((1, tm), lambda j: (0, j)),
        ],
        out_specs=pl.BlockSpec((B, tm), lambda j: (0, j)),
        compiler_params=pltpu.CompilerParams(
            dimension_semantics=("parallel",)),        # >=2 blocks: v7x dual-TC
    )(lhs, w, bias)


def _apply_activation(h, activation):
    if activation == "relu":
        return jnp.maximum(h, 0.0)
    if activation == "leaky_relu":
        return jnp.where(h > 0, h, 0.1 * h)
    return jnp.tanh(h)


def mlp_fused_kernel(*refs, activation, n_layers):
    """All MLP layers in one kernel; intermediates stay on-chip.

    refs = [x(bf16), preds(bf16), w1a, w1b, b1, (w_i, b_i)..., out].
    First layer weight is split (x-part / preds-part) so the feature concat in
    the original module becomes two matmuls instead of a lane concat.
    Dropout is identity in the eval-mode forward.
    """
    x_ref, p_ref = refs[0], refs[1]
    o_ref = refs[-1]
    wb = refs[2:-1]
    h = (jnp.dot(x_ref[...], wb[0][...], preferred_element_type=jnp.float32)
         + jnp.dot(p_ref[...], wb[1][...], preferred_element_type=jnp.float32)
         + wb[2][...])
    idx = 3
    for _ in range(1, n_layers):
        h = _apply_activation(h, activation)
        h = (jnp.dot(h.astype(jnp.bfloat16), wb[idx][...],
                     preferred_element_type=jnp.float32)
             + wb[idx + 1][...])
        idx += 2
    o_ref[...] = h


def mlp_fused(x_bf16, preds_bf16, mlp_params, activation="relu"):
    B = x_bf16.shape[0]
    n_layers = len(mlp_params)
    w1a, w1b, b1 = mlp_params[0]
    flat = [x_bf16, preds_bf16, w1a, w1b, b1]
    for (w, b) in mlp_params[1:]:
        flat += [w, b]
    out_dim = mlp_params[-1][0].shape[1]
    in_specs = [pl.BlockSpec(a.shape, lambda i: (0, 0)) for a in flat]
    return pl.pallas_call(
        functools.partial(mlp_fused_kernel, activation=activation,
                          n_layers=n_layers),
        out_shape=jax.ShapeDtypeStruct((B, out_dim), jnp.float32),
        grid=(1,),
        in_specs=in_specs,
        out_specs=pl.BlockSpec((B, out_dim), lambda i: (0, 0)),
    )(*flat)


# ---------------- parameter synthesis (deterministic, no .fit) ----------------
# TODO(synk): sklearn GaussianMixture EM fitting has no Pallas equivalent;
# GMM parameters are synthesized deterministically instead of fit on data.
def init_params(key):
    layer_sizes = [INPUT_SIZE + NUM_ENCODERS] + HIDDEN_SIZES + [NUM_CLASSES]
    n_layers = len(layer_sizes) - 1
    keys = jax.random.split(key, 3 + 2 * n_layers)

    means = jax.random.normal(keys[0], (TOTAL_COMPONENTS, INPUT_SIZE), jnp.float32)
    variances = 1.0 + jax.random.uniform(keys[1], (TOTAL_COMPONENTS, INPUT_SIZE),
                                         jnp.float32)
    raw_w = jax.random.normal(keys[2], (TOTAL_COMPONENTS,), jnp.float32)
    log_weights, off = [], 0
    for k in GMM_COMPONENTS:                       # per-encoder mixture weights
        log_weights.append(jax.nn.log_softmax(raw_w[off:off + k]))
        off += k
    log_weights = jnp.concatenate(log_weights)

    inv_var = 1.0 / variances
    w_quad = jnp.transpose(-0.5 * inv_var)         # [D, M]  (multiplies x*x)
    w_lin = jnp.transpose(means * inv_var)         # [D, M]  (multiplies x)
    gmm_w = jnp.concatenate([w_quad, w_lin], axis=0).astype(jnp.bfloat16)  # [2D, M]
    gmm_bias = (log_weights
                - 0.5 * (INPUT_SIZE * jnp.log(2.0 * jnp.pi)
                         + jnp.sum(jnp.log(variances), axis=1)
                         + jnp.sum(means * means * inv_var, axis=1))
                ).reshape(1, TOTAL_COMPONENTS).astype(jnp.float32)

    mlp = []
    for i in range(n_layers):
        fan_in, fan_out = layer_sizes[i], layer_sizes[i + 1]
        bound = 1.0 / np.sqrt(fan_in)
        w = jax.random.uniform(keys[3 + 2 * i], (fan_in, fan_out), jnp.float32,
                               -bound, bound)
        b = jax.random.uniform(keys[4 + 2 * i], (1, fan_out), jnp.float32,
                               -bound, bound)
        if i == 0:  # split first-layer weight: rows for x, rows for GMM preds
            mlp.append((w[:INPUT_SIZE].astype(jnp.bfloat16),
                        w[INPUT_SIZE:].astype(jnp.bfloat16), b))
        else:
            mlp.append((w.astype(jnp.bfloat16), b))

    return {"gmm_w": gmm_w, "gmm_bias": gmm_bias, "mlp": mlp}


# ---------------- forward pass ----------------
def _flatten_input(x):
    return x.reshape(-1, INPUT_SIZE).astype(jnp.float32)   # x.view(-1, 3*224*224)


def gmm_predict_labels(logprob):
    """Vectorized segmented argmax over each encoder's component block.

    Replaces the 32-slice Python loop (ragged, non-128-aligned slices) with a
    single masked-max + first-max-index pass over the lane-dense [B, M] array.
    Returns [num_encoders, B] float32 (matches torch stacking order).
    """
    mask = jnp.asarray(_SEG_ONEHOT)            # [M, E] bool
    within = jnp.asarray(_WITHIN_IDX)          # [M]
    neg = jnp.float32(-3.0e38)
    lp = logprob[:, None, :]                                  # [B, 1, M]
    masked = jnp.where(mask.T[None], lp, neg)                 # [B, E, M]
    seg_max = masked.max(axis=-1, keepdims=True)              # [B, E, 1]
    is_max = masked == seg_max                                # first-occurrence ties
    idx = jnp.where(is_max, within[None, None, :], TOTAL_COMPONENTS)
    labels_be = idx.min(axis=-1)                              # [B, E] int32
    return labels_be.T.astype(jnp.float32)                    # [E, B]


def pallas_logprob(params, x):
    xf = _flatten_input(x)
    lhs = jnp.concatenate([xf * xf, xf], axis=1).astype(jnp.bfloat16)  # [B, 2D]
    return gmm_logprob(lhs, params["gmm_w"], params["gmm_bias"])


def pallas_labels(params, x):
    return gmm_predict_labels(pallas_logprob(params, x))     # [E, B]


def patnet_gmm_forward(params, x):
    xf = _flatten_input(x)
    labels = pallas_labels(params, x)                         # [32, B]
    # reproduce torch `.view(-1, len(encoders))`: memory-order reshape, NOT a transpose
    preds = labels.reshape(-1, NUM_ENCODERS)                  # [B, 32]
    return mlp_fused(xf.astype(jnp.bfloat16), preds.astype(jnp.bfloat16),
                     params["mlp"], activation=ACTIVATION)


# ---------------- pure-JAX reference for self-check ----------------
def reference_labels(params, x):
    xf = _flatten_input(x)
    lhs = jnp.concatenate([xf * xf, xf], axis=1).astype(jnp.bfloat16)
    lp = (jnp.dot(lhs, params["gmm_w"], preferred_element_type=jnp.float32)
          + params["gmm_bias"])
    labels, off = [], 0
    for k in GMM_COMPONENTS:                                  # independent loop argmax
        labels.append(jnp.argmax(lp[:, off:off + k], axis=1))
        off += k
    return jnp.stack(labels, axis=0).astype(jnp.float32)      # [E, B]


def reference_forward(params, x):
    xf = _flatten_input(x)
    preds = reference_labels(params, x).reshape(-1, NUM_ENCODERS)
    xb = xf.astype(jnp.bfloat16)
    pb = preds.astype(jnp.bfloat16)
    (w1a, w1b, b1) = params["mlp"][0]
    h = (jnp.dot(xb, w1a, preferred_element_type=jnp.float32)
         + jnp.dot(pb, w1b, preferred_element_type=jnp.float32) + b1)
    for (w, b) in params["mlp"][1:]:
        h = _apply_activation(h, ACTIVATION)
        h = jnp.dot(h.astype(jnp.bfloat16), w,
                    preferred_element_type=jnp.float32) + b
    return h


if __name__ == "__main__":
    key = jax.random.PRNGKey(0)
    pkey, xkey = jax.random.split(key)
    params = init_params(pkey)

    # NCHW-style input that flattens to [BATCH, INPUT_SIZE] (1 * 8 * 8 = 64)
    x = jax.random.normal(xkey, (BATCH, 1, 8, 8), jnp.float32)

    out = jax.block_until_ready(jax.jit(patnet_gmm_forward)(params, x))
    ref = jax.block_until_ready(jax.jit(reference_forward)(params, x))
    assert out.shape == (BATCH, NUM_CLASSES)

    # label agreement (argmax robustness with bf16 matmuls), not just allclose
    lbl_pal = np.asarray(jax.block_until_ready(jax.jit(pallas_labels)(params, x)))
    lbl_ref = np.asarray(jax.block_until_ready(jax.jit(reference_labels)(params, x)))
    np.testing.assert_array_equal(lbl_pal, lbl_ref)

    np.testing.assert_allclose(np.asarray(out), np.asarray(ref),
                               rtol=1e-3, atol=1e-3)

    print("KERNEL_OK")
</pallas_src>

<mosaic_0001>
module attributes {stable_mosaic.version = 11 : i64} {
  func.func @mlp_fused_kernel(%arg0: i32, %arg1: memref<8x64xbf16, #tpu.memory_space<vmem>>, %arg2: memref<8x32xbf16, #tpu.memory_space<vmem>>, %arg3: memref<64x32xbf16, #tpu.memory_space<vmem>>, %arg4: memref<32x32xbf16, #tpu.memory_space<vmem>>, %arg5: memref<1x32xf32, #tpu.memory_space<vmem>>, %arg6: memref<32x16xbf16, #tpu.memory_space<vmem>>, %arg7: memref<1x16xf32, #tpu.memory_space<vmem>>, %arg8: memref<16x10xbf16, #tpu.memory_space<vmem>>, %arg9: memref<1x10xf32, #tpu.memory_space<vmem>>, %arg10: memref<8x10xf32, #tpu.memory_space<vmem>>) attributes {dimension_semantics = [#tpu.dimension_semantics<arbitrary>], iteration_bounds = array<i64: 1>, scalar_prefetch = 0 : i64, scratch_operands = 0 : i64, tpu.core_type = #tpu.core_type<tc>, window_params = [{pipeline_mode = #tpu.pipeline_mode<synchronous>, transform_indices = @transform_0, window_bounds = array<i64: 8, 64>}, {pipeline_mode = #tpu.pipeline_mode<synchronous>, transform_indices = @transform_1, window_bounds = array<i64: 8, 32>}, {pipeline_mode = #tpu.pipeline_mode<synchronous>, transform_indices = @transform_2, window_bounds = array<i64: 64, 32>}, {pipeline_mode = #tpu.pipeline_mode<synchronous>, transform_indices = @transform_3, window_bounds = array<i64: 32, 32>}, {pipeline_mode = #tpu.pipeline_mode<synchronous>, transform_indices = @transform_4, window_bounds = array<i64: 1, 32>}, {pipeline_mode = #tpu.pipeline_mode<synchronous>, transform_indices = @transform_5, window_bounds = array<i64: 32, 16>}, {pipeline_mode = #tpu.pipeline_mode<synchronous>, transform_indices = @transform_6, window_bounds = array<i64: 1, 16>}, {pipeline_mode = #tpu.pipeline_mode<synchronous>, transform_indices = @transform_7, window_bounds = array<i64: 16, 10>}, {pipeline_mode = #tpu.pipeline_mode<synchronous>, transform_indices = @transform_8, window_bounds = array<i64: 1, 10>}, {pipeline_mode = #tpu.pipeline_mode<synchronous>, transform_indices = @transform_9, window_bounds = array<i64: 8, 10>}]} {
    %c0 = arith.constant 0 : index
    %c0_0 = arith.constant 0 : index
    %0 = vector.load %arg1[%c0, %c0_0] : memref<8x64xbf16, #tpu.memory_space<vmem>>, vector<8x64xbf16>
    %c0_1 = arith.constant 0 : index
    %c0_2 = arith.constant 0 : index
    %1 = vector.load %arg3[%c0_1, %c0_2] : memref<64x32xbf16, #tpu.memory_space<vmem>>, vector<64x32xbf16>
    %cst = arith.constant dense<0.000000e+00> : vector<8x32xf32>
    %2 = tpu.matmul %0, %1, %cst {dimension_numbers = #tpu.dot_dimension_numbers<[1], [0], [0], [1], [0, 0, 1, 1], [], []>} : vector<8x64xbf16>, vector<64x32xbf16>, vector<8x32xf32> -> vector<8x32xf32>
    %c0_3 = arith.constant 0 : index
    %c0_4 = arith.constant 0 : index
    %3 = vector.load %arg2[%c0_3, %c0_4] : memref<8x32xbf16, #tpu.memory_space<vmem>>, vector<8x32xbf16>
    %c0_5 = arith.constant 0 : index
    %c0_6 = arith.constant 0 : index
    %4 = vector.load %arg4[%c0_5, %c0_6] : memref<32x32xbf16, #tpu.memory_space<vmem>>, vector<32x32xbf16>
    %cst_7 = arith.constant dense<0.000000e+00> : vector<8x32xf32>
    %5 = tpu.matmul %3, %4, %cst_7 {dimension_numbers = #tpu.dot_dimension_numbers<[1], [0], [0], [1], [0, 0, 1, 1], [], []>} : vector<8x32xbf16>, vector<32x32xbf16>, vector<8x32xf32> -> vector<8x32xf32>
    %6 = arith.addf %2, %5 : vector<8x32xf32>
    %c0_8 = arith.constant 0 : index
    %c0_9 = arith.constant 0 : index
    %7 = vector.load %arg5[%c0_8, %c0_9] : memref<1x32xf32, #tpu.memory_space<vmem>>, vector<1x32xf32>
    %8 = vector.broadcast %7 : vector<1x32xf32> to vector<8x32xf32>
    %9 = arith.addf %6, %8 : vector<8x32xf32>
    %cst_10 = arith.constant 0.000000e+00 : f32
    %10 = vector.broadcast %cst_10 : f32 to vector<8x32xf32>
    %11 = arith.maximumf %9, %10 : vector<8x32xf32>
    %12 = arith.truncf %11 : vector<8x32xf32> to vector<8x32xbf16>
    %c0_11 = arith.constant 0 : index
    %c0_12 = arith.constant 0 : index
    %13 = vector.load %arg6[%c0_11, %c0_12] : memref<32x16xbf16, #tpu.memory_space<vmem>>, vector<32x16xbf16>
    %cst_13 = arith.constant dense<0.000000e+00> : vector<8x16xf32>
    %14 = tpu.matmul %12, %13, %cst_13 {dimension_numbers = #tpu.dot_dimension_numbers<[1], [0], [0], [1], [0, 0, 1, 1], [], []>} : vector<8x32xbf16>, vector<32x16xbf16>, vector<8x16xf32> -> vector<8x16xf32>
    %c0_14 = arith.constant 0 : index
    %c0_15 = arith.constant 0 : index
    %15 = vector.load %arg7[%c0_14, %c0_15] : memref<1x16xf32, #tpu.memory_space<vmem>>, vector<1x16xf32>
    %16 = vector.broadcast %15 : vector<1x16xf32> to vector<8x16xf32>
    %17 = arith.addf %14, %16 : vector<8x16xf32>
    %cst_16 = arith.constant 0.000000e+00 : f32
    %18 = vector.broadcast %cst_16 : f32 to vector<8x16xf32>
    %19 = arith.maximumf %17, %18 : vector<8x16xf32>
    %20 = arith.truncf %19 : vector<8x16xf32> to vector<8x16xbf16>
    %c0_17 = arith.constant 0 : index
    %c0_18 = arith.constant 0 : index
    %21 = vector.load %arg8[%c0_17, %c0_18] : memref<16x10xbf16, #tpu.memory_space<vmem>>, vector<16x10xbf16>
    %cst_19 = arith.constant dense<0.000000e+00> : vector<8x10xf32>
    %22 = tpu.matmul %20, %21, %cst_19 {dimension_numbers = #tpu.dot_dimension_numbers<[1], [0], [0], [1], [0, 0, 1, 1], [], []>} : vector<8x16xbf16>, vector<16x10xbf16>, vector<8x10xf32> -> vector<8x10xf32>
    %c0_20 = arith.constant 0 : index
    %c0_21 = arith.constant 0 : index
    %23 = vector.load %arg9[%c0_20, %c0_21] : memref<1x10xf32, #tpu.memory_space<vmem>>, vector<1x10xf32>
    %24 = vector.broadcast %23 : vector<1x10xf32> to vector<8x10xf32>
    %25 = arith.addf %22, %24 : vector<8x10xf32>
    %c0_22 = arith.constant 0 : index
    %c0_23 = arith.constant 0 : index
    %26 = vector.load %arg10[%c0_22, %c0_23] : memref<8x10xf32, #tpu.memory_space<vmem>>, vector<8x10xf32>
    tpu.vector_store %arg10[%c0_22, %c0_23], %25 {strides = array<i32>} : memref<8x10xf32, #tpu.memory_space<vmem>>, vector<8x10xf32>,
    return
  }
  func.func @transform_0(%arg0: i32) -> (i32, i32) {
    %c0_i32 = arith.constant 0 : i32
    %c0_i32_0 = arith.constant 0 : i32
    %c0_i32_1 = arith.constant 0 : i32
    return %c0_i32, %c0_i32_0 : i32, i32
  }
  func.func @transform_1(%arg0: i32) -> (i32, i32) {
    %c0_i32 = arith.constant 0 : i32
    %c0_i32_0 = arith.constant 0 : i32
    %c0_i32_1 = arith.constant 0 : i32
    return %c0_i32, %c0_i32_0 : i32, i32
  }
  func.func @transform_2(%arg0: i32) -> (i32, i32) {
    %c0_i32 = arith.constant 0 : i32
    %c0_i32_0 = arith.constant 0 : i32
    %c0_i32_1 = arith.constant 0 : i32
    return %c0_i32, %c0_i32_0 : i32, i32
  }
  func.func @transform_3(%arg0: i32) -> (i32, i32) {
    %c0_i32 = arith.constant 0 : i32
    %c0_i32_0 = arith.constant 0 : i32
    %c0_i32_1 = arith.constant 0 : i32
    return %c0_i32, %c0_i32_0 : i32, i32
  }
  func.func @transform_4(%arg0: i32) -> (i32, i32) {
    %c0_i32 = arith.constant 0 : i32
    %c0_i32_0 = arith.constant 0 : i32
    %c0_i32_1 = arith.constant 0 : i32
    return %c0_i32, %c0_i32_0 : i32, i32
  }
  func.func @transform_5(%arg0: i32) -> (i32, i32) {
    %c0_i32 = arith.constant 0 : i32
    %c0_i32_0 = arith.constant 0 : i32
    %c0_i32_1 = arith.constant 0 : i32
    return %c0_i32, %c0_i32_0 : i32, i32
  }
  func.func @transform_6(%arg0: i32) -> (i32, i32) {
    %c0_i32 = arith.constant 0 : i32
    %c0_i32_0 = arith.constant 0 : i32
    %c0_i32_1 = arith.constant 0 : i32
    return %c0_i32, %c0_i32_0 : i32, i32
  }
  func.func @transform_7(%arg0: i32) -> (i32, i32) {
    %c0_i32 = arith.constant 0 : i32
    %c0_i32_0 = arith.constant 0 : i32
    %c0_i32_1 = arith.constant 0 : i32
    return %c0_i32, %c0_i32_0 : i32, i32
  }
  func.func @transform_8(%arg0: i32) -> (i32, i32) {
    %c0_i32 = arith.constant 0 : i32
    %c0_i32_0 = arith.constant 0 : i32
    %c0_i32_1 = arith.constant 0 : i32
    return %c0_i32, %c0_i32_0 : i32, i32
  }
  func.func @transform_9(%arg0: i32) -> (i32, i32) {
    %c0_i32 = arith.constant 0 : i32
    %c0_i32_0 = arith.constant 0 : i32
    %c0_i32_1 = arith.constant 0 : i32
    return %c0_i32, %c0_i32_0 : i32, i32
  }
}

module attributes {stable_mosaic.version = 11 : i64} {
  func.func @gmm_logprob_kernel(%arg0: i32, %arg1: memref<8x128xbf16, #tpu.memory_space<vmem>>, %arg2: memref<128x1024xbf16, #tpu.memory_space<vmem>>, %arg3: memref<1x1024xf32, #tpu.memory_space<vmem>>, %arg4: memref<8x1024xf32, #tpu.memory_space<vmem>>) attributes {dimension_semantics = [#tpu.dimension_semantics<parallel>], iteration_bounds = array<i64: 2>, scalar_prefetch = 0 : i64, scratch_operands = 0 : i64, tpu.core_type = #tpu.core_type<tc>, window_params = [{pipeline_mode = #tpu.pipeline_mode<synchronous>, transform_indices = @transform_0, window_bounds = array<i64: 8, 128>}, {transform_indices = @transform_1, window_bounds = array<i64: 128, 1024>}, {transform_indices = @transform_2, window_bounds = array<i64: 1, 1024>}, {transform_indices = @transform_3, window_bounds = array<i64: 8, 1024>}]} {
    %c0 = arith.constant 0 : index
    %c0_0 = arith.constant 0 : index
    %0 = vector.load %arg1[%c0, %c0_0] : memref<8x128xbf16, #tpu.memory_space<vmem>>, vector<8x128xbf16>
    %c0_1 = arith.constant 0 : index
    %c0_2 = arith.constant 0 : index
    %1 = vector.load %arg2[%c0_1, %c0_2] : memref<128x1024xbf16, #tpu.memory_space<vmem>>, vector<128x1024xbf16>
    %cst = arith.constant dense<0.000000e+00> : vector<8x1024xf32>
    %2 = tpu.matmul %0, %1, %cst {dimension_numbers = #tpu.dot_dimension_numbers<[1], [0], [0], [1], [0, 0, 1, 1], [], []>} : vector<8x128xbf16>, vector<128x1024xbf16>, vector<8x1024xf32> -> vector<8x1024xf32>
    %c0_3 = arith.constant 0 : index
    %c0_4 = arith.constant 0 : index
    %3 = vector.load %arg3[%c0_3, %c0_4] : memref<1x1024xf32, #tpu.memory_space<vmem>>, vector<1x1024xf32>
    %4 = vector.broadcast %3 : vector<1x1024xf32> to vector<8x1024xf32>
    %5 = arith.addf %2, %4 : vector<8x1024xf32>
    %c0_5 = arith.constant 0 : index
    %c0_6 = arith.constant 0 : index
    %6 = vector.load %arg4[%c0_5, %c0_6] : memref<8x1024xf32, #tpu.memory_space<vmem>>, vector<8x1024xf32>
    tpu.vector_store %arg4[%c0_5, %c0_6], %5 {strides = array<i32>} : memref<8x1024xf32, #tpu.memory_space<vmem>>, vector<8x1024xf32>,
    return
  }
  func.func @transform_0(%arg0: i32) -> (i32, i32) {
    %c0_i32 = arith.constant 0 : i32
    %c0_i32_0 = arith.constant 0 : i32
    %c0_i32_1 = arith.constant 0 : i32
    return %c0_i32, %c0_i32_0 : i32, i32
  }
  func.func @transform_1(%arg0: i32) -> (i32, i32) {
    %c0_i32 = arith.constant 0 : i32
    %c0_i32_0 = arith.constant 0 : i32
    return %c0_i32, %arg0 : i32, i32
  }
  func.func @transform_2(%arg0: i32) -> (i32, i32) {
    %c0_i32 = arith.constant 0 : i32
    %c0_i32_0 = arith.constant 0 : i32
    return %c0_i32, %arg0 : i32, i32
  }
  func.func @transform_3(%arg0: i32) -> (i32, i32) {
    %c0_i32 = arith.constant 0 : i32
    %c0_i32_0 = arith.constant 0 : i32
    return %c0_i32, %arg0 : i32, i32
  }
}

</mosaic_0001>

<bundles_post_ra>
// kernel: patnet_gmm_forward.3
= control target key start
LH: loop header
LB: loop body
LE: loop exit
PB: predicated region body
PF: predicated region fallthrough
CT: control target
= control target key end

     0   :  { %14 = vsyncpa [#allocation3], 0  ;;  %s599_s0 = inlined_call_operand.vmem [shape: bf16[8,64], index: 0, kind: input, shape index: {}]   ;;  %s600_s1 = inlined_call_operand.vmem [shape: bf16[8,32], index: 1, kind: input, shape index: {}]   ;;  %s601_s2 = inlined_call_operand.vmem [shape: bf16[64,32], index: 2, kind: input, shape index: {}]   ;;  %s602_s3 = inlined_call_operand.hbm [shape: bf16[32,32], index: 3, kind: input, shape index: {}]   ;;  %s603_s4 = inlined_call_operand.hbm [shape: f32[1,32], index: 4, kind: input, shape index: {}]   ;;  %s604_s5 = inlined_call_operand.vmem [shape: bf16[32,16], index: 5, kind: input, shape index: {}]   ;;  %s605_s6 = inlined_call_operand.hbm [shape: f32[1,16], index: 6, kind: input, shape index: {}]   ;;  %s606_s7 = inlined_call_operand.hbm [shape: bf16[16,10], index: 7, kind: input, shape index: {}]   ;;  %s607_s8 = inlined_call_operand.hbm [shape: f32[1,10], index: 8, kind: input, shape index: {}]   ;;  %s608_s9 = inlined_call_operand.hbm [shape: f32[8,10], index: 9, kind: output, shape index: {}]  }
   0x1   :  { %15 = vsyncpa [#allocation6], 0 }
   0x2   :  { %16 = vsyncpa [#allocation9], 0  ;;  %s42_s11 = sshll.u32 %s603_s4, 4  ;;  %s43_s11 = int_to_ptr.hbm [resolvable:$true] %s42_s11 }
   0x3   :  { %17 = vsyncpa [#allocation4], 0  ;;  %s497_s12 = smov [#allocation5]   ;;  %s65_s16 = sshll.u32 %s606_s7, 4  ;;  %s66_s16 = int_to_ptr.hbm [resolvable:$true] %s65_s16 }
   0x4   :  { %s44_s13 = sshll.u32 %s497_s12, 4  ;;  %s498_s17 = smov [#allocation8]   ;;  %s45_s13 = int_to_ptr.vmem [resolvable:$true] %s44_s13 }
   0x5   :  { %47 = dma.hbm_to_vmem [thread:$0]  %s43_s11, 16, %s45_s13, [#allocation6]  }
   0x6   :  { %s67_s18 = sshll.u32 %s498_s17, 4  ;;  %s28_s21 = sshll.u32 %s602_s3, 4  ;;  %s68_s18 = int_to_ptr.vmem [resolvable:$true] %s67_s18  ;;  %s29_s21 = int_to_ptr.hbm [resolvable:$true] %s28_s21 }
   0x7   :  { %s499_s4 = smov 64   ;;  %s500_s22 = smov 4  }
   0x8   :  { %73 = dma.hbm_to_vmem [thread:$0]  %s66_s16, 128, %s68_s18, [#allocation9], %s499_s4, %s499_s4, %s500_s22  }
   0x9   :  { %s55_s25 = sshll.u32 %s605_s6, 4  ;;  %s501_s26 = smov [#allocation2]   ;;  %s56_s25 = int_to_ptr.hbm [resolvable:$true] %s55_s25 }
   0xa   :  { %s30_s27 = sshll.u32 %s501_s26, 4  ;;  %s502_s7 = smov [#allocation7]   ;;  %s31_s27 = int_to_ptr.vmem [resolvable:$true] %s30_s27 }
   0xb   :  { %36 = dma.hbm_to_vmem [thread:$0]  %s29_s21, 256, %s31_s27, [#allocation3], %s499_s4, %s499_s4, %s500_s22  }
   0xc   :  { %s57_s28 = sshll.u32 %s502_s7, 4  ;;  %s79_s3 = sshll.u32 %s607_s8, 4  ;;  %s58_s28 = int_to_ptr.vmem [resolvable:$true] %s57_s28  ;;  %s80_s3 = int_to_ptr.hbm [resolvable:$true] %s79_s3 }
   0xd   :  { %60 = dma.hbm_to_vmem [thread:$0]  %s56_s25, 16, %s58_s28, [#allocation6]  }
   0xe   :  { %s503_s10 = smov [#allocation10]  }
   0xf   :  { %s81_s11 = sshll.u32 %s503_s10, 4  ;;  %s82_s11 = int_to_ptr.vmem [resolvable:$true] %s81_s11 }
  0x10   :  { %84 = dma.hbm_to_vmem [thread:$0]  %s80_s3, 16, %s82_s11, [#allocation9]  }
  0x11   :  { %489 = dma.done.wait [#allocation3], 256  }
  0x12   :  { %490 = vsyncadd [#allocation3], 4294967040 }
  0x13   :  { %491 = dma.done.wait [#allocation6], 32  }
  0x14   :  { %492 = vsyncadd [#allocation6], 4294967264 }
  0x15   :  { %493 = dma.done.wait [#allocation9], 144  }
  0x16   :  { %494 = vsyncadd [#allocation9], 4294967152  ;;  %v330_v0 = vld [vmem:[#allocation2 + $0x8] sm:$0xff]  ;;  %v328_v1 = vld [vmem:[%s601_s2 + $0x18] sm:$0xff]  ;;  %vm132_vm0 = vcmask 261120   ;;  %vm173_vm1 = vcmask 523264  }
  0x17   :  { %142 = vmatpush.bf16.msra.mxu0 %v330_v0  ;;  %181 = vmatpush.bf16.msra.mxu1 %v328_v1  ;;  %v329_v2 = vld [vmem:[#allocation2] sm:$0xff]  ;;  %v327_v3 = vld [vmem:[%s601_s2 + $0x10] sm:$0xff]  ;;  %v326_v5 = vld [vmem:[%s601_s2 + $0x8] sm:$0xff]  ;;  %vm247_vm2 = vcmask 130048   ;;  %s273_s25 = sshll.u32 %s608_s9, 4  ;;  %vm264_vm3 = vcmask 80896   ;;  %s274_s25 = int_to_ptr.hbm [resolvable:$true] %s273_s25 }
  0x18   :  { %v115_v4 = vld [vmem:[%s600_s1] sm:$0xf]  ;;  %v332_v8 = vld [vmem:[%s604_s5 + $0x8] sm:$0xff]  ;;  %v342_v11 = vld [vmem:[#allocation5] ss:$0 sm:$0xff] }
  0x19   :  { %v325_v6 = vld [vmem:[%s601_s2] sm:$0xff]  ;;  %226 = vmatpush.bf16.msra.mxu2 %v332_v8  ;;  %v333_v19 = vld [vmem:[#allocation8] sm:$0xff]  ;;  %v343_v20 = vld [vmem:[#allocation7] ss:$0 sm:$0xff] }
  0x1a   :  { %v106_v7 = vld [vmem:[%s599_s0] sm:$0xf]  ;;  %258 = vmatpush.bf16.msra.mxu3 %v333_v19  ;;  %v344_v26 = vld [vmem:[#allocation10] ss:$0 sm:$0xff]  ;;  %s504_s0 = smov [#allocation11]  }
  0x1b   :  { %143 = vmatpush.bf16.msra.mxu0 %v329_v2  ;;  %182 = vmatpush.bf16.msra.mxu1 %v327_v3  ;;  %v331_v9 = vld [vmem:[%s604_s5] sm:$0xff]  ;;  %s271_s2 = sshll.u32 %s504_s0, 4  ;;  %s272_s2 = int_to_ptr.vmem [resolvable:$true] %s271_s2 }
  0x1d   :  { %227 = vmatpush.bf16.msra.mxu2 %v331_v9 }
  0x1e   :  { %293 = vmatmul.msk.bf16.vlgmr.msra.gmra.mxu0 %vm132_vm0, %v115_v4 }
  0x1f   :  { %183 = vmatpush.bf16.msra.mxu1 %v326_v5 }
  0x23   :  { %184 = vmatpush.bf16.msra.mxu1 %v325_v6 }
  0x26   :  { %310 = vmatmul.msk.bf16.vlgmr.msra.gmra.mxu1 %vm173_vm1, %v106_v7 }
  0x9b   :  { %v145_v10 = vpop.f32.mrf.mxu0 }
  0xa3   :  { %v147_v12 = vpop.f32.mrf.mxu0  ;;  %v186_v13 = vpop.f32.mrf.mxu1 }
  0xa4   :  { %v187_v14 = vadd.f32 %v186_v13, %v145_v10 }
  0xa6   :  { %v194_v15 = vadd.f32 %v342_v11, %v187_v14 }
  0xa8   :  { %v195_v16 = vmax.f32 %v194_v15, 0.0 }
  0xaa   :  { %v196_v17 = vpack.c.bf16 %v195_v16, %v195_v16 }
  0xab   :  { %v188_v18 = vpop.f32.mrf.mxu1 }
  0xac   :  { %319 = vmatmul.msk.bf16.vlgmr.msra.gmra.mxu2 %vm132_vm0, %v196_v17 }
 0x12f   :  { %v229_v21 = vpop.f32.mrf.mxu2 }
 0x130   :  { %v230_v22 = vadd.f32 %v343_v20, %v229_v21 }
 0x132   :  { %v233_v23 = vmax.f32 %v230_v22, 0.0 }
 0x134   :  { %v234_v24 = vpack.c.bf16 %v233_v23, %v233_v23 }
 0x136   :  { %324 = vmatmul.msk.bf16.vlgmr.msra.gmra.mxu3 %vm247_vm2, %v234_v24 }
 0x137   :  { %v231_v25 = vpop.f32.mrf.mxu2 }
 0x1b9   :  { %v260_v27 = vpop.f32.mrf.mxu3 }
 0x1ba   :  { %v261_v28 = vadd.f32 %v344_v26, %v260_v27 }
 0x1bc   :  { %265 = vst.msk [vmem:[#allocation11] sm:$0xff] %vm264_vm3, %v261_v28 }
 0x1bd   :  { %276 = dma.vmem_to_hbm [thread:$0]  %s272_s2, 128, %s274_s25, [#allocation4]  }
 0x1c1   :  { %v262_v29 = vpop.f32.mrf.mxu3 }
 0x1c2   :  { %495 = dma.done.wait [#allocation4], 128  }
 0x1c3   :  { %496 = vsyncadd [#allocation4], 4294967168 }
 0x1c4   :  { %281 = vsyncpa [#allocation3], 1 }
 0x1c5   :  { %282 = vsyncpa [#allocation6], 1 }
 0x1c6   :  { %283 = vsyncpa [#allocation9], 1 }
 0x1c7   :  { %284 = vsyncpa [#allocation4], 1 }

// kernel: patnet_gmm_forward.2
= control target key start
LH: loop header
LB: loop body
LE: loop exit
PB: predicated region body
PF: predicated region fallthrough
CT: control target
= control target key end

     0   :  { %8 = vsyncpa [#allocation3], 0  ;;  %s1626_s0 = inlined_call_operand.vmem [shape: bf16[8,128], index: 0, kind: input, shape index: {}]   ;;  %s1627_s1 = inlined_call_operand.hbm [shape: bf16[128,2048], index: 1, kind: input, shape index: {}]   ;;  %s1628_s2 = inlined_call_operand.hbm [shape: f32[1,2048], index: 2, kind: input, shape index: {}]   ;;  %s1629_s3 = inlined_call_operand.vmem [shape: f32[8,2048], index: 3, kind: output, shape index: {}]  }
   0x1   :  { %10 = vsyncpa [#allocation3 + $0x1], 0 }
   0x2   :  { %11 = vsyncpa [#allocation5], 0 }
   0x3   :  { %13 = vsyncpa [#allocation5 + $0x1], 0  ;;  %s1347_s12 = smov 0   ;;  %s1349_s13 = smov 0  }
   0x4   :  { %s1351_s14 = smov 0   ;;  %s1353_s15 = smov 0  }
   0x5 LB: > { %s840_s16 = sadd.s32 4294967295, %s1322_s15   ;;  %s1367_s17 = sadd.s32 1, %s1322_s15   ;;  %s1322_s15 = sphi %s1353_s15, %s1637_s15   ;;  %s1318_s14 = sphi %s1351_s14, %s1636_s14   ;;  %s1314_s13 = sphi %s1349_s13, %s1635_s13   ;;  %s1310_s12 = sphi %s1347_s12, %s1634_s12  }
   0x6   : > { %s44_s18 = ssub.s32 %s1322_s15, %s1367_s17  ;;  %s47_s19 = sadd.s32 1, %s1318_s14 }
   0x7   : > { %p45_p0 = scmp.eq.s32.totalorder %s44_s18, 0  ;;  %p54_p1 = scmp.ne.s32.totalorder %s1318_s14, %s1314_s13 }
   0x8   : > { %p55_p2 = scmp.eq.s32.totalorder %s1322_s15, 0  ;;  %p60_p3 = scmp.ne.s32.totalorder %s1314_s13, %s1310_s12 }
   0x9   : > { %s1377_s20 = scalar_select %p45_p0, %s1318_s14, %s47_s19  }
   0xa   : > { %p1379_p4 = por %p55_p2, %p54_p1  ;;  %p61_p5 = scmp.eq.s32.totalorder %s840_s16, 0 }
   0xb   : > { %p1188_p6 = scmp.lt.s32.totalorder %s1322_s15, 2  ;;  %s1391_s23 = sand.u32 1, %s1318_s14  }
   0xc   : > { %p1386_p7 = por %p61_p5, %p60_p3  ;;  %s844_s24 = sshll.u32 %s1391_s23, 9 }
   0xd   : > { %s1112_s25 = sshll.u32 %s1322_s15, 5  ;;  %s143_s29 = scalar_lea.vmem [#allocation2], %s844_s24 }
   0xe   : > { %s148_s28 = scalar_lea.hbm %s1627_s1, %s1112_s25  ;;  %s151_s30 = sshll.u32 %s143_s29, 4  ;;  %s152_s30 = int_to_ptr.vmem [resolvable:$true] %s151_s30 }
   0xf   : > { %s149_s4 = sshll.u32 %s148_s28, 4  ;;  %p1400_p8 = pnand %p1188_p6, %p1379_p4  ;;  %s150_s4 = int_to_ptr.hbm [resolvable:$true] %s149_s4 }
  0x10   : > { %s140_s6 = scalar_lea.sflag [#allocation3], %s1391_s23  ;;  %s1224_s7 = sshra.s32 %s150_s4, 4  ;;  %s1225_s7 = int_to_ptr.hbm [resolvable:$true] %s1224_s7 }
  0x11   : > { %s1226_s8 = scalar_lea.hbm %s1225_s7, 512  ;;  %p1228_p10 = pneg %p1400_p8 }
  0x12   : > { %p1227_p9 = scmp.ne.s32.totalorder %s1225_s7, %s1226_s8  ;;  %s1231_s11 = scalar_lea.hbm %s1627_s1, 1024 }
  0x13   : > { %p1232_p13 = scmp.lt.s32.totalorder %s1225_s7, %s1627_s1  ;;  %p1233_p0 = scmp.lt.s32.totalorder %s1231_s11, %s1226_s8 }
  0x14   : > { %p1229_p11 = pnand %p1228_p10, %p1227_p9 }
  0x15   : > { %p1234_p1 = por %p1233_p0, %p1232_p13 }
  0x16   : > { %p1230_p12 = pneg %p1229_p11 }
  0x18   : > { %p1235_p2 = pnand %p1234_p1, %p1230_p12 }
  0x1a   : > { %1238 = shalt.err (!%p1235_p2)
}
  0x1b   : > { %s1324_s19 = smov 1024   ;;  %s1325_s21 = smov 512  }
  0x1c   : > { %s1326_s24 = smov 32   ;;  %p849_p3 = scmp.ge.s32.totalorder %s1322_s15, 1 }
  0x1d   : > { %1184 = dma.hbm_to_vmem [thread:$0]  (!%p1400_p8), %s150_s4, 8192, %s152_s30, %s140_s6, %s1324_s19, %s1325_s21, %s1326_s24  }
  0x1e   : > { %p178_p4 = scmp.lt.s32.totalorder %s1322_s15, 3  ;;  %s847_s25 = sshll.u32 %s1391_s23, 3 }
  0x1f   : > { %s848_s27 = sshll.u32 %s1322_s15, 3  ;;  %s165_s28 = scalar_lea.vmem [#allocation4], %s847_s25 }
  0x20   : > { %p1421_p5 = pnand %p849_p3, %p178_p4  ;;  %s173_s29 = sshll.u32 %s165_s28, 4  ;;  %s174_s29 = int_to_ptr.vmem [resolvable:$true] %s173_s29 }
  0x21   : > { %s169_s9 = scalar_lea.hbm %s1628_s2, %s848_s27  ;;  %s162_s11 = scalar_lea.sflag [#allocation5], %s1391_s23 }
  0x22   : > { %s171_s10 = sshll.u32 %s169_s9, 4  ;;  %s1261_s18 = scalar_lea.hbm %s1628_s2, 16  ;;  %s172_s10 = int_to_ptr.hbm [resolvable:$true] %s171_s10 }
  0x23   : > { %s1254_s30 = sshra.s32 %s172_s10, 4  ;;  %s1255_s30 = int_to_ptr.hbm [resolvable:$true] %s1254_s30 }
  0x24   : > { %s1256_s4 = scalar_lea.hbm %s1255_s30, 8  ;;  %p1262_p12 = scmp.lt.s32.totalorder %s1255_s30, %s1628_s2 }
  0x25   : > { %p1257_p6 = scmp.ne.s32.totalorder %s1255_s30, %s1256_s4  ;;  %p1263_p13 = scmp.lt.s32.totalorder %s1261_s18, %s1256_s4 }
  0x27   : > { %p1259_p9 = pnand %p1257_p6, %p1228_p10  ;;  %p1264_p0 = por %p1263_p13, %p1262_p12 }
  0x29   : > { %p1260_p11 = pneg %p1259_p9 }
  0x2b   : > { %p1265_p1 = pnand %p1264_p0, %p1260_p11 }
  0x2d   : > { %1268 = shalt.err (!%p1265_p1)
}
  0x2e   : > { %1187 = dma.hbm_to_vmem [thread:$0]  (!%p1400_p8), %s172_s10, 128, %s174_s29, %s162_s11  }
  0x2f   : > { %182 = sbr.rel (%p1421_p5) target bundleno = 265 (0x109), region = 32  ;;  %s184_s23 = sand.u32 (!%p1421_p5), 1, %s1314_s13  }
  0x30   : > { %s850_s24 = sshll.u32 (!%p1421_p5), %s184_s23, 9  ;;  %s185_s25 = scalar_lea.sflag (!%p1421_p5), [#allocation3], %s184_s23 }
  0x31   : > { %s1444_s27 = scalar_lea.vmem (!%p1421_p5), [#allocation2], %s850_s24 }
  0x34   : > { %1301 = dma.done.wait (%p1386_p7), %s185_s25, 8192  }
  0x35   : > { %1303 = vsyncadd (%p1386_p7), %s185_s25, 4294959104  ;;  %s851_s28 = sshll.u32 %s184_s23, 3  ;;  %s195_s7 = scalar_lea.sflag [#allocation5], %s184_s23 }
  0x36   : > { %s1450_s5 = scalar_lea.vmem [#allocation4], %s851_s28 }
  0x37   : > { %1305 = dma.done.wait (%p1386_p7), %s195_s7, 128  }
  0x38   : > { %1307 = vsyncadd (%p1386_p7), %s195_s7, 4294967168  ;;  %v1080_v0 = vld [vmem:[%s1444_s27 + $0x1c0] sm:$0xf]  ;;  %v1169_v2 = vld [vmem:[%s1444_s27 + $0x1c4] sm:$0xf]  ;;  %s852_s29 = sshll.u32 %s840_s16, 3 }
  0x39   : > { %v1173_v1 = vld [vmem:[%s1444_s27 + $0x1dc] sm:$0xf0]  ;;  %v1082_v4 = vld [vmem:[%s1444_s27 + $0x1e0] sm:$0xf0]  ;;  %v1088_v5 = vld [vmem:[%s1444_s27 + $0x1c8] sm:$0xf] }
  0x3a   : > { %v1081_v3 = vor.u32 %v1173_v1, %v1080_v0  ;;  %v1174_v6 = vld [vmem:[%s1444_s27 + $0x1e4] sm:$0xf0]  ;;  %v1085_v7 = vor.u32 %v1169_v2, %v1082_v4  ;;  %v1170_v9 = vld [vmem:[%s1444_s27 + $0x1cc] sm:$0xf]  ;;  %v1048_v11 = vld [vmem:[%s1444_s27 + $0x180] sm:$0xf] }
  0x3b   : > { %v1089_v8 = vor.u32 %v1174_v6, %v1088_v5  ;;  %v1090_v10 = vld [vmem:[%s1444_s27 + $0x1e8] sm:$0xf0]  ;;  %v1165_v13 = vld [vmem:[%s1444_s27 + $0x19c] sm:$0xf0]  ;;  %v1161_v14 = vld [vmem:[%s1444_s27 + $0x184] sm:$0xf] }
  0x3c   : > { %638 = vmatpush.bf16.msra.mxu0 %v1081_v3  ;;  %v1093_v12 = vor.u32 %v1170_v9, %v1090_v10  ;;  %v1050_v15 = vld [vmem:[%s1444_s27 + $0x1a0] sm:$0xf0]  ;;  %651 = vmatpush.bf16.msra.mxu1 %v1085_v7  ;;  %v1049_v16 = vor.u32 %v1165_v13, %v1048_v11  ;;  %v1056_v18 = vld [vmem:[%s1444_s27 + $0x188] sm:$0xf]  ;;  %v1162_v20 = vld [vmem:[%s1444_s27 + $0x18c] sm:$0xf] }
  0x3d   : > { %664 = vmatpush.bf16.msra.mxu2 %v1089_v8  ;;  %v1053_v17 = vor.u32 %v1161_v14, %v1050_v15  ;;  %v1166_v19 = vld [vmem:[%s1444_s27 + $0x1a4] sm:$0xf0]  ;;  %v1058_v22 = vld [vmem:[%s1444_s27 + $0x1a8] sm:$0xf0]  ;;  %v1016_v23 = vld [vmem:[%s1444_s27 + $0x140] sm:$0xf] }
  0x3e   : > { %677 = vmatpush.bf16.msra.mxu3 %v1093_v12  ;;  %v1057_v21 = vor.u32 %v1166_v19, %v1056_v18  ;;  %v1157_v24 = vld [vmem:[%s1444_s27 + $0x15c] sm:$0xf0]  ;;  %v1061_v25 = vor.u32 %v1162_v20, %v1058_v22  ;;  %v1153_v26 = vld [vmem:[%s1444_s27 + $0x144] sm:$0xf]  ;;  %v1024_v28 = vld [vmem:[%s1444_s27 + $0x148] sm:$0xf] }
  0x3f   : > { %v1018_v27 = vld [vmem:[%s1444_s27 + $0x160] sm:$0xf0]  ;;  %v1017_v29 = vor.u32 %v1157_v24, %v1016_v23  ;;  %v1158_v30 = vld [vmem:[%s1444_s27 + $0x164] sm:$0xf0]  ;;  %v1154_v31 = vld [vmem:[%s1444_s27 + $0x14c] sm:$0xf] }
  0x40   : > { %639 = vmatpush.bf16.msra.mxu0 %v1049_v16  ;;  %v1026_v32 = vld [vmem:[%s1444_s27 + $0x168] sm:$0xf0]  ;;  %652 = vmatpush.bf16.msra.mxu1 %v1053_v17  ;;  %v1021_v33 = vor.u32 %v1153_v26, %v1018_v27  ;;  %v1025_v34 = vor.u32 %v1158_v30, %v1024_v28  ;;  %v984_v35 = vld [vmem:[%s1444_s27 + $0x100] sm:$0xf]  ;;  %v1145_v37 = vld [vmem:[%s1444_s27 + $0x104] sm:$0xf] }
  0x41   : > { %665 = vmatpush.bf16.msra.mxu2 %v1057_v21  ;;  %v1149_v36 = vld [vmem:[%s1444_s27 + $0x11c] sm:$0xf0]  ;;  %v1029_v38 = vor.u32 %v1154_v31, %v1026_v32  ;;  %v986_v39 = vld [vmem:[%s1444_s27 + $0x120] sm:$0xf0]  ;;  %v992_v40 = vld [vmem:[%s1444_s27 + $0x108] sm:$0xf] }
  0x42   : > { %678 = vmatpush.bf16.msra.mxu3 %v1061_v25  ;;  %v1150_v41 = vld [vmem:[%s1444_s27 + $0x124] sm:$0xf0]  ;;  %v1146_v42 = vld [vmem:[%s1444_s27 + $0x10c] sm:$0xf]  ;;  %v985_v44 = vor.u32 %v1149_v36, %v984_v35  ;;  %v989_v45 = vor.u32 %v1145_v37, %v986_v39  ;;  %v952_v47 = vld [vmem:[%s1444_s27 + $0xc0] sm:$0xf] }
  0x43   : > { %v994_v43 = vld [vmem:[%s1444_s27 + $0x128] sm:$0xf0]  ;;  %v993_v46 = vor.u32 %v1150_v41, %v992_v40  ;;  %v1141_v48 = vld [vmem:[%s1444_s27 + $0xdc] sm:$0xf0]  ;;  %v1137_v49 = vld [vmem:[%s1444_s27 + $0xc4] sm:$0xf] }
  0x44   : > { %640 = vmatpush.bf16.msra.mxu0 %v1017_v29  ;;  %653 = vmatpush.bf16.msra.mxu1 %v1021_v33  ;;  %v997_v50 = vor.u32 %v1146_v42, %v994_v43  ;;  %v954_v51 = vld [vmem:[%s1444_s27 + $0xe0] sm:$0xf0]  ;;  %v960_v52 = vld [vmem:[%s1444_s27 + $0xc8] sm:$0xf]  ;;  %v1138_v54 = vld [vmem:[%s1444_s27 + $0xcc] sm:$0xf]  ;;  %v953_v56 = vor.u32 %v1141_v48, %v952_v47 }
  0x45   : > { %666 = vmatpush.bf16.msra.mxu2 %v1025_v34  ;;  %v1142_v53 = vld [vmem:[%s1444_s27 + $0xe4] sm:$0xf0]  ;;  %v962_v55 = vld [vmem:[%s1444_s27 + $0xe8] sm:$0xf0]  ;;  %v957_v57 = vor.u32 %v1137_v49, %v954_v51  ;;  %v920_v59 = vld [vmem:[%s1444_s27 + $0x80] sm:$0xf] }
  0x46   : > { %679 = vmatpush.bf16.msra.mxu3 %v1029_v38  ;;  %v961_v58 = vor.u32 %v1142_v53, %v960_v52  ;;  %v1133_v60 = vld [vmem:[%s1444_s27 + $0x9c] sm:$0xf0]  ;;  %v1129_v61 = vld [vmem:[%s1444_s27 + $0x84] sm:$0xf]  ;;  %v965_v62 = vor.u32 %v1138_v54, %v962_v55  ;;  %v928_v0 = vld [vmem:[%s1444_s27 + $0x88] sm:$0xf] }
  0x47   : > { %v922_v63 = vld [vmem:[%s1444_s27 + $0xa0] sm:$0xf0]  ;;  %v1134_v1 = vld [vmem:[%s1444_s27 + $0xa4] sm:$0xf0]  ;;  %v1130_v2 = vld [vmem:[%s1444_s27 + $0x8c] sm:$0xf]  ;;  %v921_v4 = vor.u32 %v1133_v60, %v920_v59 }
  0x48   : > { %641 = vmatpush.bf16.msra.mxu0 %v985_v44  ;;  %654 = vmatpush.bf16.msra.mxu1 %v989_v45  ;;  %v930_v3 = vld [vmem:[%s1444_s27 + $0xa8] sm:$0xf0]  ;;  %v925_v5 = vor.u32 %v1129_v61, %v922_v63  ;;  %v929_v6 = vor.u32 %v1134_v1, %v928_v0  ;;  %v888_v7 = vld [vmem:[%s1444_s27 + $0x40] sm:$0xf]  ;;  %v1121_v9 = vld [vmem:[%s1444_s27 + $0x44] sm:$0xf] }
  0x49   : > { %667 = vmatpush.bf16.msra.mxu2 %v993_v46  ;;  %v1125_v8 = vld [vmem:[%s1444_s27 + $0x5c] sm:$0xf0]  ;;  %v933_v10 = vor.u32 %v1130_v2, %v930_v3  ;;  %v890_v11 = vld [vmem:[%s1444_s27 + $0x60] sm:$0xf0]  ;;  %v896_v12 = vld [vmem:[%s1444_s27 + $0x48] sm:$0xf] }
  0x4a   : > { %680 = vmatpush.bf16.msra.mxu3 %v997_v50  ;;  %v1126_v13 = vld [vmem:[%s1444_s27 + $0x64] sm:$0xf0]  ;;  %v1122_v14 = vld [vmem:[%s1444_s27 + $0x4c] sm:$0xf]  ;;  %v889_v16 = vor.u32 %v1125_v8, %v888_v7  ;;  %v856_v17 = vld [vmem:[%s1444_s27] sm:$0xf]  ;;  %v893_v19 = vor.u32 %v1121_v9, %v890_v11 }
  0x4b   : > { %v898_v15 = vld [vmem:[%s1444_s27 + $0x68] sm:$0xf0]  ;;  %v1117_v18 = vld [vmem:[%s1444_s27 + $0x1c] sm:$0xf0]  ;;  %v897_v20 = vor.u32 %v1126_v13, %v896_v12  ;;  %v1113_v21 = vld [vmem:[%s1444_s27 + $0x4] sm:$0xf] }
  0x4c   : > { %642 = vmatpush.bf16.msra.mxu0 %v953_v56  ;;  %655 = vmatpush.bf16.msra.mxu1 %v957_v57  ;;  %v858_v22 = vld [vmem:[%s1444_s27 + $0x20] sm:$0xf0]  ;;  %v864_v23 = vld [vmem:[%s1444_s27 + $0x8] sm:$0xf]  ;;  %v901_v24 = vor.u32 %v1122_v14, %v898_v15  ;;  %v1114_v26 = vld [vmem:[%s1444_s27 + $0xc] sm:$0xf]  ;;  %v857_v31 = vor.u32 %v1117_v18, %v856_v17 }
  0x4d   : > { %668 = vmatpush.bf16.msra.mxu2 %v961_v58  ;;  %v1118_v25 = vld [vmem:[%s1444_s27 + $0x24] sm:$0xf0]  ;;  %v866_v27 = vld [vmem:[%s1444_s27 + $0x28] sm:$0xf0]  ;;  %v1096_v28 = vld [vmem:[%s1444_s27 + $0x1d0] sm:$0xf]  ;;  %v861_v35 = vor.u32 %v1113_v21, %v858_v22 }
  0x4e   : > { %681 = vmatpush.bf16.msra.mxu3 %v965_v62  ;;  %v1175_v29 = vld [vmem:[%s1444_s27 + $0x1ec] sm:$0xf0]  ;;  %v1171_v30 = vld [vmem:[%s1444_s27 + $0x1d4] sm:$0xf]  ;;  %v1104_v33 = vld [vmem:[%s1444_s27 + $0x1d8] sm:$0xf]  ;;  %v865_v36 = vor.u32 %v1118_v25, %v864_v23  ;;  %v869_v39 = vor.u32 %v1114_v26, %v866_v27 }
  0x4f   : > { %v1098_v32 = vld [vmem:[%s1444_s27 + $0x1f0] sm:$0xf0]  ;;  %v1176_v34 = vld [vmem:[%s1444_s27 + $0x1f4] sm:$0xf0]  ;;  %v1172_v37 = vld [vmem:[%s1444_s27 + $0x1dc] sm:$0xf]  ;;  %v1097_v40 = vor.u32 %v1175_v29, %v1096_v28 }
  0x50   : > { %643 = vmatpush.bf16.msra.mxu0 %v921_v4  ;;  %656 = vmatpush.bf16.msra.mxu1 %v925_v5  ;;  %v1106_v38 = vld [vmem:[%s1444_s27 + $0x1f8] sm:$0xf0]  ;;  %v1101_v41 = vor.u32 %v1171_v30, %v1098_v32  ;;  %v1105_v42 = vor.u32 %v1176_v34, %v1104_v33  ;;  %v1064_v43 = vld [vmem:[%s1444_s27 + $0x190] sm:$0xf]  ;;  %v1163_v45 = vld [vmem:[%s1444_s27 + $0x194] sm:$0xf] }
  0x51   : > { %669 = vmatpush.bf16.msra.mxu2 %v929_v6  ;;  %v1167_v44 = vld [vmem:[%s1444_s27 + $0x1ac] sm:$0xf0]  ;;  %v1109_v46 = vor.u32 %v1172_v37, %v1106_v38  ;;  %v1066_v47 = vld [vmem:[%s1444_s27 + $0x1b0] sm:$0xf0]  ;;  %v1072_v48 = vld [vmem:[%s1444_s27 + $0x198] sm:$0xf] }
  0x52   : > { %682 = vmatpush.bf16.msra.mxu3 %v933_v10  ;;  %v1168_v49 = vld [vmem:[%s1444_s27 + $0x1b4] sm:$0xf0]  ;;  %v1164_v50 = vld [vmem:[%s1444_s27 + $0x19c] sm:$0xf]  ;;  %v1539_v52 = vld [vmem:[%s1626_s0] sm:$0xf]  ;;  %v1065_v53 = vor.u32 %v1167_v44, %v1064_v43  ;;  %v1069_v54 = vor.u32 %v1163_v45, %v1066_v47 }
  0x53   : > { %v1074_v51 = vld [vmem:[%s1444_s27 + $0x1b8] sm:$0xf0]  ;;  %v1073_v55 = vor.u32 %v1168_v49, %v1072_v48  ;;  %v1032_v56 = vld [vmem:[%s1444_s27 + $0x150] sm:$0xf]  ;;  %v1155_v58 = vld [vmem:[%s1444_s27 + $0x154] sm:$0xf] }
  0x54   : > { %644 = vmatpush.bf16.msra.mxu0 %v889_v16  ;;  %657 = vmatpush.bf16.msra.mxu1 %v893_v19  ;;  %v1159_v57 = vld [vmem:[%s1444_s27 + $0x16c] sm:$0xf0]  ;;  %v1077_v59 = vor.u32 %v1164_v50, %v1074_v51  ;;  %v1034_v60 = vld [vmem:[%s1444_s27 + $0x170] sm:$0xf0]  ;;  %v1040_v61 = vld [vmem:[%s1444_s27 + $0x158] sm:$0xf] }
  0x55   : > { %670 = vmatpush.bf16.msra.mxu2 %v897_v20  ;;  %v1160_v62 = vld [vmem:[%s1444_s27 + $0x174] sm:$0xf0]  ;;  %v1156_v63 = vld [vmem:[%s1444_s27 + $0x15c] sm:$0xf]  ;;  %v1033_v1 = vor.u32 %v1159_v57, %v1032_v56  ;;  %v1037_v2 = vor.u32 %v1155_v58, %v1034_v60  ;;  %v1000_v4 = vld [vmem:[%s1444_s27 + $0x110] sm:$0xf] }
  0x56   : > { %683 = vmatpush.bf16.msra.mxu3 %v901_v24  ;;  %v1042_v0 = vld [vmem:[%s1444_s27 + $0x178] sm:$0xf0]  ;;  %v1041_v3 = vor.u32 %v1160_v62, %v1040_v61  ;;  %v1151_v5 = vld [vmem:[%s1444_s27 + $0x12c] sm:$0xf0]  ;;  %v1147_v6 = vld [vmem:[%s1444_s27 + $0x114] sm:$0xf] }
  0x57   : > { %v1045_v7 = vor.u32 %v1156_v63, %v1042_v0  ;;  %v1002_v8 = vld [vmem:[%s1444_s27 + $0x130] sm:$0xf0]  ;;  %v1008_v9 = vld [vmem:[%s1444_s27 + $0x118] sm:$0xf]  ;;  %v1148_v11 = vld [vmem:[%s1444_s27 + $0x11c] sm:$0xf]  ;;  %v1001_v13 = vor.u32 %v1151_v5, %v1000_v4 }
  0x58   : > { %645 = vmatpush.bf16.msra.mxu0 %v857_v31  ;;  %658 = vmatpush.bf16.msra.mxu1 %v861_v35  ;;  %v1152_v10 = vld [vmem:[%s1444_s27 + $0x134] sm:$0xf0]  ;;  %v1010_v12 = vld [vmem:[%s1444_s27 + $0x138] sm:$0xf0]  ;;  %v1005_v14 = vor.u32 %v1147_v6, %v1002_v8  ;;  %v968_v16 = vld [vmem:[%s1444_s27 + $0xd0] sm:$0xf] }
  0x59   : > { %671 = vmatpush.bf16.msra.mxu2 %v865_v36  ;;  %v1009_v15 = vor.u32 %v1152_v10, %v1008_v9  ;;  %v1143_v17 = vld [vmem:[%s1444_s27 + $0xec] sm:$0xf0]  ;;  %v1139_v18 = vld [vmem:[%s1444_s27 + $0xd4] sm:$0xf]  ;;  %v1013_v19 = vor.u32 %v1148_v11, %v1010_v12  ;;  %v976_v21 = vld [vmem:[%s1444_s27 + $0xd8] sm:$0xf] }
  0x5a   : > { %684 = vmatpush.bf16.msra.mxu3 %v869_v39  ;;  %v970_v20 = vld [vmem:[%s1444_s27 + $0xf0] sm:$0xf0]  ;;  %v1144_v22 = vld [vmem:[%s1444_s27 + $0xf4] sm:$0xf0]  ;;  %v1140_v23 = vld [vmem:[%s1444_s27 + $0xdc] sm:$0xf]  ;;  %v969_v25 = vor.u32 %v1143_v17, %v968_v16 }
  0x5b   : > { %646 = vmatmul.bf16.vlgmr.msra.gmra.mxu0 %v1539_v52  ;;  %659 = vmatmul.bf16.vlgmr.msra.gmra.mxu1 %v1539_v52  ;;  %v978_v24 = vld [vmem:[%s1444_s27 + $0xf8] sm:$0xf0]  ;;  %v973_v26 = vor.u32 %v1139_v18, %v970_v20  ;;  %v977_v27 = vor.u32 %v1144_v22, %v976_v21  ;;  %v936_v28 = vld [vmem:[%s1444_s27 + $0x90] sm:$0xf]  ;;  %v1131_v30 = vld [vmem:[%s1444_s27 + $0x94] sm:$0xf] }
  0x5c   : > { %690 = vmatpush.bf16.msrb.mxu0 %v1097_v40  ;;  %703 = vmatpush.bf16.msrb.mxu1 %v1101_v41  ;;  %v1135_v29 = vld [vmem:[%s1444_s27 + $0xac] sm:$0xf0]  ;;  %v981_v31 = vor.u32 %v1140_v23, %v978_v24  ;;  %v938_v32 = vld [vmem:[%s1444_s27 + $0xb0] sm:$0xf0]  ;;  %v944_v33 = vld [vmem:[%s1444_s27 + $0x98] sm:$0xf] }
  0x5d   : > { %716 = vmatpush.bf16.msrb.mxu2 %v1105_v42  ;;  %685 = vmatmul.bf16.vlgmr.msra.gmra.mxu3 %v1539_v52  ;;  %v1136_v34 = vld [vmem:[%s1444_s27 + $0xb4] sm:$0xf0]  ;;  %v1132_v35 = vld [vmem:[%s1444_s27 + $0x9c] sm:$0xf]  ;;  %v937_v37 = vor.u32 %v1135_v29, %v936_v28  ;;  %v941_v38 = vor.u32 %v1131_v30, %v938_v32  ;;  %v904_v40 = vld [vmem:[%s1444_s27 + $0x50] sm:$0xf] }
  0x5e   : > { %729 = vmatpush.bf16.msrb.mxu3 %v1109_v46  ;;  %672 = vmatmul.bf16.vlgmr.msra.gmra.mxu2 %v1539_v52  ;;  %v946_v36 = vld [vmem:[%s1444_s27 + $0xb8] sm:$0xf0]  ;;  %v945_v39 = vor.u32 %v1136_v34, %v944_v33  ;;  %v1127_v41 = vld [vmem:[%s1444_s27 + $0x6c] sm:$0xf0]  ;;  %v1123_v42 = vld [vmem:[%s1444_s27 + $0x54] sm:$0xf] }
  0x5f   : > { %v949_v43 = vor.u32 %v1132_v35, %v946_v36  ;;  %v906_v44 = vld [vmem:[%s1444_s27 + $0x70] sm:$0xf0]  ;;  %v912_v45 = vld [vmem:[%s1444_s27 + $0x58] sm:$0xf]  ;;  %v1124_v47 = vld [vmem:[%s1444_s27 + $0x5c] sm:$0xf]  ;;  %v905_v49 = vor.u32 %v1127_v41, %v904_v40 }
  0x60   : > { %691 = vmatpush.bf16.msrb.mxu0 %v1065_v53  ;;  %704 = vmatpush.bf16.msrb.mxu1 %v1069_v54  ;;  %v1128_v46 = vld [vmem:[%s1444_s27 + $0x74] sm:$0xf0]  ;;  %v914_v48 = vld [vmem:[%s1444_s27 + $0x78] sm:$0xf0]  ;;  %v909_v50 = vor.u32 %v1123_v42, %v906_v44  ;;  %v872_v53 = vld [vmem:[%s1444_s27 + $0x10] sm:$0xf] }
  0x61   : > { %717 = vmatpush.bf16.msrb.mxu2 %v1073_v55  ;;  %v913_v51 = vor.u32 %v1128_v46, %v912_v45  ;;  %v1119_v54 = vld [vmem:[%s1444_s27 + $0x2c] sm:$0xf0]  ;;  %v1115_v55 = vld [vmem:[%s1444_s27 + $0x14] sm:$0xf]  ;;  %v917_v56 = vor.u32 %v1124_v47, %v914_v48  ;;  %v880_v58 = vld [vmem:[%s1444_s27 + $0x18] sm:$0xf] }
  0x62   : > { %730 = vmatpush.bf16.msrb.mxu3 %v1077_v59  ;;  %v874_v57 = vld [vmem:[%s1444_s27 + $0x30] sm:$0xf0]  ;;  %v1120_v59 = vld [vmem:[%s1444_s27 + $0x34] sm:$0xf0]  ;;  %v1116_v60 = vld [vmem:[%s1444_s27 + $0x1c] sm:$0xf]  ;;  %v873_v62 = vor.u32 %v1119_v54, %v872_v53 }
  0x63   : > { %v882_v61 = vld [vmem:[%s1444_s27 + $0x38] sm:$0xf0]  ;;  %v877_v63 = vor.u32 %v1115_v55, %v874_v57  ;;  %v881_v0 = vor.u32 %v1120_v59, %v880_v58  ;;  %p230_p7 = scmp.lt.s32.totalorder %s852_s29, 15 }
  0x64   : > { %692 = vmatpush.bf16.msrb.mxu0 %v1033_v1  ;;  %705 = vmatpush.bf16.msrb.mxu1 %v1037_v2  ;;  %v885_v1 = vor.u32 %v1116_v60, %v882_v61  ;;  %v300_v2 = vld [vmem:[%s1450_s5] sm:$0xff] }
  0x65   : > { %718 = vmatpush.bf16.msrb.mxu2 %v1041_v3  ;;  %s1639_s29 = smov (!%p230_p7, %s852_s29), 15  ;;  %v302_v3 = vperm.slane %v300_v2, 0  ;;  %v303_v4 = vperm.slane %v300_v2, 1  ;;  %v304_v8 = vperm.slane %v300_v2, 2  ;;  %v305_v9 = vperm.slane %v300_v2, 3 }
  0x66   : > { %731 = vmatpush.bf16.msrb.mxu3 %v1045_v7  ;;  %s853_s8 = sshll.u32 %s1639_s29, 3  ;;  %v306_v18 = vperm.slane %v300_v2, 4  ;;  %v308_v24 = vperm.slane %v300_v2, 6 }
  0x67   : > { %s1603_s11 = scalar_lea.vmem %s1629_s3, %s853_s8 }
  0x68   : > { %693 = vmatpush.bf16.msrb.mxu0 %v1001_v13  ;;  %706 = vmatpush.bf16.msrb.mxu1 %v1005_v14 }
  0x69   : > { %719 = vmatpush.bf16.msrb.mxu2 %v1009_v15 }
  0x6a   : > { %732 = vmatpush.bf16.msrb.mxu3 %v1013_v19  ;;  %v307_v19 = vperm.slane %v300_v2, 5 }
  0x6c   : > { %694 = vmatpush.bf16.msrb.mxu0 %v969_v25  ;;  %707 = vmatpush.bf16.msrb.mxu1 %v973_v26  ;;  %v309_v25 = vperm.slane %v300_v2, 7 }
  0x6d   : > { %720 = vmatpush.bf16.msrb.mxu2 %v977_v27 }
  0x6e   : > { %733 = vmatpush.bf16.msrb.mxu3 %v981_v31 }
  0x70   : > { %695 = vmatpush.bf16.msrb.mxu0 %v937_v37  ;;  %708 = vmatpush.bf16.msrb.mxu1 %v941_v38 }
  0x71   : > { %721 = vmatpush.bf16.msrb.mxu2 %v945_v39 }
  0x72   : > { %734 = vmatpush.bf16.msrb.mxu3 %v949_v43 }
  0x74   : > { %696 = vmatpush.bf16.msrb.mxu0 %v905_v49  ;;  %709 = vmatpush.bf16.msrb.mxu1 %v909_v50 }
  0x75   : > { %722 = vmatpush.bf16.msrb.mxu2 %v913_v51 }
  0x76   : > { %735 = vmatpush.bf16.msrb.mxu3 %v917_v56 }
  0x78   : > { %697 = vmatpush.bf16.msrb.mxu0 %v873_v62  ;;  %710 = vmatpush.bf16.msrb.mxu1 %v877_v63 }
  0x79   : > { %723 = vmatpush.bf16.msrb.mxu2 %v881_v0 }
  0x7a   : > { %736 = vmatpush.bf16.msrb.mxu3 %v885_v1 }
  0x7b   : > { %698 = vmatmul.bf16.vlgmr.msrb.gmra.mxu0 %v1539_v52  ;;  %711 = vmatmul.bf16.vlgmr.msrb.gmra.mxu1 %v1539_v52 }
  0x7c   : > { %724 = vmatmul.bf16.vlgmr.msrb.gmra.mxu2 %v1539_v52 }
  0x7d   : > { %737 = vmatmul.bf16.vlgmr.msrb.gmra.mxu3 %v1539_v52 }
  0xd8   : > { %v647_v5 = vpop.f32.mrf.mxu0  ;;  %v660_v52 = vpop.f32.mrf.mxu1 }
  0xd9   : > { %v648_v6 = vadd.f32 %v647_v5, %v302_v3  ;;  %v661_v7 = vadd.f32 %v660_v52, %v303_v4 }
  0xdb   : > { %742 = vst [vmem:[%s1603_s11] sm:$0xff] %v648_v6 }
  0xdc   : > { %743 = vst [vmem:[%s1603_s11 + $0x8] sm:$0xff] %v661_v7 }
  0xe0   : > { %v686_v12 = vpop.f32.mrf.mxu3  ;;  %v649_v14 = vpop.f32.mrf.mxu0 }
  0xe1   : > { %v673_v10 = vpop.f32.mrf.mxu2  ;;  %v687_v13 = vadd.f32 %v686_v12, %v305_v9  ;;  %v662_v15 = vpop.f32.mrf.mxu1 }
  0xe2   : > { %v674_v11 = vadd.f32 %v673_v10, %v304_v8 }
  0xe3   : > { %745 = vst [vmem:[%s1603_s11 + $0x18] sm:$0xff] %v687_v13 }
  0xe4   : > { %744 = vst [vmem:[%s1603_s11 + $0x10] sm:$0xff] %v674_v11 }
  0xe8   : > { %v688_v17 = vpop.f32.mrf.mxu3 }
  0xe9   : > { %v675_v16 = vpop.f32.mrf.mxu2 }
  0xf8   : > { %v699_v20 = vpop.f32.mrf.mxu0  ;;  %v712_v22 = vpop.f32.mrf.mxu1 }
  0xf9   : > { %v700_v21 = vadd.f32 %v699_v20, %v306_v18  ;;  %v713_v23 = vadd.f32 %v712_v22, %v307_v19 }
  0xfb   : > { %746 = vst [vmem:[%s1603_s11 + $0x20] sm:$0xff] %v700_v21 }
  0xfc   : > { %747 = vst [vmem:[%s1603_s11 + $0x28] sm:$0xff] %v713_v23 }
  0xff   : > { %v725_v26 = vpop.f32.mrf.mxu2 }
 0x100   : > { %v726_v27 = vadd.f32 %v725_v26, %v308_v24  ;;  %v738_v28 = vpop.f32.mrf.mxu3  ;;  %v701_v29 = vpop.f32.mrf.mxu0 }
 0x101   : > { %v739_v30 = vadd.f32 %v738_v28, %v309_v25  ;;  %v714_v31 = vpop.f32.mrf.mxu1 }
 0x102   : > { %748 = vst [vmem:[%s1603_s11 + $0x30] sm:$0xff] %v726_v27 }
 0x103   : > { %749 = vst [vmem:[%s1603_s11 + $0x38] sm:$0xff] %v739_v30 }
 0x107   : > { %v727_v32 = vpop.f32.mrf.mxu2 }
 0x108   : > { %v740_v33 = vpop.f32.mrf.mxu3 }
 0x109 PF: > { %p16_p8 = scmp.ge.s32.totalorder %s1367_s17, 4   ;;  %s1634_s12 = smov %s1314_s13 }
 0x10a   : > { %s1635_s13 = smov %s1318_s14  ;;  %s1636_s14 = smov %s1377_s20 }
 0x10b   : > { %s1637_s15 = smov %s1367_s17  ;;  %18 = sbr.rel (!%p16_p8) target bundleno = 5 (0x5), region = 85 }
 0x110   :  { %772 = vsyncpa [#allocation3], 1 }
 0x111   :  { %774 = vsyncpa [#allocation3 + $0x1], 1 }
 0x112   :  { %775 = vsyncpa [#allocation5], 1 }
 0x113   :  { %777 = vsyncpa [#allocation5 + $0x1], 1 }

</bundles_post_ra>
